<compile_context>
chip_gen: v6e
topology: v6e:2x2x1
jax: 0.10.0
libtpu: 0.0.40
codegen_flags: <defaults>
</compile_context>

<pallas_src>
import functools
import math

import jax
import jax.numpy as jnp
from jax.experimental import pallas as pl
from jax.experimental.pallas import tpu as pltpu


# --------------------------------------------------------------------------- #
# Kernel
# --------------------------------------------------------------------------- #
def _if_neuron_kernel(thr_ref, x_ref, mem_in_ref, spk_in_ref,
                      spike_seq_ref, mem_ref, spk_ref, *, reset_mode):
    """One (row_tile, t) grid step.  mem_ref / spk_ref are VMEM-resident across t."""
    t = pl.program_id(1)

    # Load initial state into the resident output blocks once per row tile.
    @pl.when(t == 0)
    def _():
        mem_ref[...] = mem_in_ref[...]
        spk_ref[...] = spk_in_ref[...]

    thr = thr_ref[0]
    slot = t % 2                               # parity slot currently holding spike[t-2]
    x = x_ref[0].astype(jnp.float32)           # accept bf16/f32 x, compute in f32
    mem = mem_ref[...]

    if reset_mode == "soft":
        prev = spk_ref[slot].astype(jnp.float32)
        mem = mem * (1.0 - prev) + x
    else:
        mem = mem + x

    fired = mem >= thr
    spike_bf = fired.astype(spk_ref.dtype)     # values are exactly 0/1 -> bf16 is lossless
    if reset_mode == "hard":
        mem = mem * (1.0 - fired.astype(jnp.float32))

    # State update: parity slot becomes "prev" again two steps later (matches torch order).
    mem_ref[...] = mem
    spk_ref[slot] = spike_bf
    spike_seq_ref[0] = spike_bf.astype(spike_seq_ref.dtype)


# --------------------------------------------------------------------------- #
# Layout / budgets
# --------------------------------------------------------------------------- #
def _round_up(a, b):
    return -(-a // b) * b


@functools.lru_cache(maxsize=None)
def _tpu_budgets():
    """(scoped vmem limit bytes, per-array f32 block-byte cap), generation-aware."""
    cap = 64 * 1024 * 1024
    try:
        cap = int(getattr(pltpu.get_tpu_info(), "vmem_capacity_bytes", cap))
    except Exception:
        pass
    if cap <= 64 * 1024 * 1024:                 # v7x-class: 64 MiB VMEM per TensorCore
        return 48 * 1024 * 1024, 2 * 1024 * 1024
    return 100 * 1024 * 1024, 4 * 1024 * 1024   # v5e / v6e: 128 MiB physical VMEM


def _choose_layout(num_elems, block_cap_bytes):
    """Lane-dense (rows, LANE) view of the flat feature vector.

    Prefers a LANE that divides E exactly (no pad/slice copies over the big tensors);
    falls back to padding only when E % 128 != 0.
    Returns (lane, rows, tr, num_row_tiles, padded).
    """
    lane = next((l for l in (1024, 512, 256, 128) if num_elems % l == 0), None)
    padded = lane is None
    if padded:                                  # rare for NN activations
        lane = 128
    rows = -(-num_elems // lane)
    max_tr = max(8, (block_cap_bytes // (lane * 4)) // 8 * 8)
    if rows < 16:
        tr = rows                               # full-dim block (exempt from the 8-row rule)
    elif rows <= max_tr:
        tr = min(max_tr, _round_up(-(-rows // 2), 8))   # >=2 tiles for v7x megacore
    else:
        tr = max_tr
    num_tiles = -(-rows // tr)
    return lane, rows, tr, num_tiles, padded


# --------------------------------------------------------------------------- #
# Wrapper
# --------------------------------------------------------------------------- #
@functools.partial(jax.jit, static_argnames=("reset_mode", "spike_dtype"))
def if_neuron_sequence(x_seq, mem_pot, spike, prev_spike, threshold,
                       *, reset_mode="soft", spike_dtype=jnp.bfloat16):
    """Fused T-timestep IFNeuron forward.

    x_seq:                       (T, *feat)   any float dtype (bf16 recommended)
    mem_pot, spike, prev_spike:  (*feat)      state (0/1 values for spike/prev)
    threshold:                   scalar
    Returns (spike_seq[(T,*feat), spike_dtype], new_mem f32, new_spike f32, new_prev f32).
    """
    T = x_seq.shape[0]
    feat_shape = x_seq.shape[1:]
    E = math.prod(feat_shape)
    vmem_limit, block_cap = _tpu_budgets()
    lane, rows, tr, num_tiles, padded = _choose_layout(E, block_cap)
    P = rows * lane

    def to_slab(a, dtype):
        flat = a.reshape(-1).astype(dtype)
        if padded:
            flat = jnp.pad(flat, (0, P - E))
        return flat.reshape(rows, lane)

    if padded:
        x2 = jnp.pad(x_seq.reshape(T, -1), ((0, 0), (0, P - E))).reshape(T, rows, lane)
    else:
        x2 = x_seq.reshape(T, rows, lane)       # pure reshape: no copy, native dtype

    m2 = to_slab(mem_pot, jnp.float32)
    # Parity spike buffer: slot0 is read at even steps (first read = prev_spike at t=0),
    # slot1 at odd steps (first read = spike at t=1)  -> stack [prev_spike, spike].
    sp2 = jnp.stack([to_slab(prev_spike, jnp.bfloat16),
                     to_slab(spike, jnp.bfloat16)])
    thr = jnp.asarray(threshold, jnp.float32).reshape(1)

    kernel = functools.partial(_if_neuron_kernel, reset_mode=reset_mode)
    grid = (num_tiles, T)

    spike_seq, m_out, sp_out = pl.pallas_call(
        kernel,
        out_shape=(
            jax.ShapeDtypeStruct((T, rows, lane), spike_dtype),    # spike[t], streamed
            jax.ShapeDtypeStruct((rows, lane), jnp.float32),       # final membrane
            jax.ShapeDtypeStruct((2, rows, lane), jnp.bfloat16),   # parity spike buffer
        ),
        grid=grid,
        in_specs=[
            pl.BlockSpec(memory_space=pltpu.MemorySpace.SMEM),     # threshold scalar
            pl.BlockSpec((1, tr, lane), lambda i, t: (t, i, 0)),   # x[t] (streamed)
            pl.BlockSpec((tr, lane), lambda i, t: (i, 0)),         # mem in   (resident over t)
            pl.BlockSpec((2, tr, lane), lambda i, t: (0, i, 0)),   # spikes in (resident over t)
        ],
        out_specs=(
            pl.BlockSpec((1, tr, lane), lambda i, t: (t, i, 0)),   # spike[t] out
            pl.BlockSpec((tr, lane), lambda i, t: (i, 0)),         # mem state (written back once)
            pl.BlockSpec((2, tr, lane), lambda i, t: (0, i, 0)),   # spike state
        ),
        # In-place state update: mem_in -> mem_out, spike buffer in -> out.
        input_output_aliases={2: 1, 3: 2},
        compiler_params=pltpu.CompilerParams(
            dimension_semantics=("parallel", "arbitrary"),
            vmem_limit_bytes=vmem_limit,
        ),
    )(thr, x2, m2, sp2)

    s_last = (T - 1) % 2                        # slot holding spike[T-1]
    if padded:
        spike_out = spike_seq.reshape(T, -1)[:, :E].reshape((T,) + feat_shape)
        unslab = lambda a: a.reshape(-1)[:E].reshape(feat_shape)
    else:
        spike_out = spike_seq.reshape((T,) + feat_shape)
        unslab = lambda a: a.reshape(feat_shape)

    new_mem = unslab(m_out)
    new_spike = unslab(sp_out[s_last]).astype(jnp.float32)
    new_prev = unslab(sp_out[1 - s_last]).astype(jnp.float32)
    return spike_out, new_mem, new_spike, new_prev


class IFNeuron:
    """Stateful wrapper mirroring the PyTorch module's forward behavior."""

    def __init__(self, threshold=1.0, surrogate_grad="sigmoid", scale=5.0,
                 reset="soft", spike_dtype=jnp.bfloat16):
        self.threshold = jnp.float32(threshold)   # nn.Parameter(torch.tensor(threshold))
        self.scale = scale
        self.surrogate_grad = surrogate_grad      # training-only; forward value unaffected
        self.reset_mode = reset
        self.spike_dtype = spike_dtype            # spikes are exactly 0/1 -> bf16 lossless
        self.reset_state()

    def reset_state(self):
        self.mem_pot = None
        self.spike = None
        self.prev_spike = None

    def _ensure_state(self, feat_shape):
        if self.mem_pot is None or self.mem_pot.shape != tuple(feat_shape):
            self.mem_pot = jnp.zeros(feat_shape, jnp.float32)
            self.spike = jnp.zeros(feat_shape, jnp.float32)
            self.prev_spike = jnp.zeros(feat_shape, jnp.float32)

    def __call__(self, x):
        """Single timestep (same interface as the torch module).

        NOTE: per-step chaining re-streams the state every call; prefer run_sequence."""
        self._ensure_state(x.shape)
        spike_seq, self.mem_pot, self.spike, self.prev_spike = if_neuron_sequence(
            x[None], self.mem_pot, self.spike, self.prev_spike, self.threshold,
            reset_mode=self.reset_mode, spike_dtype=self.spike_dtype)
        return spike_seq[0]

    def run_sequence(self, x_seq):
        """Fused T-timestep forward: state stays in VMEM for all T steps."""
        self._ensure_state(x_seq.shape[1:])
        spike_seq, self.mem_pot, self.spike, self.prev_spike = if_neuron_sequence(
            x_seq, self.mem_pot, self.spike, self.prev_spike, self.threshold,
            reset_mode=self.reset_mode, spike_dtype=self.spike_dtype)
        return spike_seq


# --------------------------------------------------------------------------- #
# Pure-JAX reference and self-test
# --------------------------------------------------------------------------- #
def _reference_sequence(x_seq, thr, reset_mode="soft"):
    mem = jnp.zeros_like(x_seq[0])
    spike = jnp.zeros_like(x_seq[0])
    prev = jnp.zeros_like(x_seq[0])
    outs = []
    for t in range(x_seq.shape[0]):
        x = x_seq[t]
        if reset_mode == "soft":
            mem = mem * (1.0 - prev) + x
        else:
            mem = mem + x
        prev = spike
        s = (mem >= thr).astype(jnp.float32)
        spike = s
        if reset_mode == "hard":
            mem = mem * (1.0 - s)
        outs.append(s)
    return jnp.stack(outs), mem, spike, prev


if __name__ == "__main__":
    key = jax.random.PRNGKey(0)
    N, C, H, W = 2, 4, 16, 16
    T = 8
    shape = (N, C, H, W)
    x_seq = jax.random.normal(key, (T,) + shape, jnp.float32) * 2.0

    # Fused multi-timestep path, both reset modes.
    for mode in ("soft", "hard"):
        neuron = IFNeuron(threshold=1.0, reset=mode)
        spikes = neuron.run_sequence(x_seq)
        jax.block_until_ready(spikes)
        ref_spikes, ref_mem, ref_spike, ref_prev = _reference_sequence(x_seq, 1.0, mode)
        assert spikes.shape == (T,) + shape and spikes.dtype == jnp.bfloat16
        assert jnp.array_equal(spikes.astype(jnp.float32), ref_spikes), f"{mode}: spike mismatch"
        assert jnp.allclose(neuron.mem_pot, ref_mem, atol=1e-5), f"{mode}: mem mismatch"
        assert jnp.array_equal(neuron.spike, ref_spike), f"{mode}: spike-state mismatch"
        assert jnp.array_equal(neuron.prev_spike, ref_prev), f"{mode}: prev-spike mismatch"

    # Per-step (T=1) chained calls must reproduce the same recurrence.
    neuron2 = IFNeuron(threshold=1.0, reset="soft")
    ref_spikes, ref_mem, _, _ = _reference_sequence(x_seq, 1.0, "soft")
    step_outs = jnp.stack([neuron2(x_seq[t]).astype(jnp.float32) for t in range(T)])
    jax.block_until_ready(step_outs)
    assert jnp.array_equal(step_outs, ref_spikes), "per-step chaining mismatch"
    assert jnp.allclose(neuron2.mem_pot, ref_mem, atol=1e-5)

    # Native-bf16 input path (dominant stream halved); reference fed the same bf16-rounded x.
    x_bf = x_seq.astype(jnp.bfloat16)
    neuron3 = IFNeuron(threshold=1.0, reset="soft")
    spikes_bf = neuron3.run_sequence(x_bf)
    jax.block_until_ready(spikes_bf)
    ref_bf = _reference_sequence(x_bf.astype(jnp.float32), 1.0, "soft")[0]
    assert jnp.array_equal(spikes_bf.astype(jnp.float32), ref_bf), "bf16-x mismatch"

    print("KERNEL_OK")
</pallas_src>

<mosaic_0001>
module attributes {stable_mosaic.version = 11 : i64} {
  func.func @_if_neuron_kernel(%arg0: i32, %arg1: i32, %arg2: memref<1xf32, #tpu.memory_space<smem>>, %arg3: memref<1x2x1024xf32, #tpu.memory_space<vmem>>, %arg4: memref<2x1024xf32, #tpu.memory_space<vmem>>, %arg5: memref<2x2x1024xbf16, #tpu.memory_space<vmem>>, %arg6: memref<1x2x1024xbf16, #tpu.memory_space<vmem>>, %arg7: memref<2x1024xf32, #tpu.memory_space<vmem>>, %arg8: memref<2x2x1024xbf16, #tpu.memory_space<vmem>>) attributes {dimension_semantics = [#tpu.dimension_semantics<parallel>, #tpu.dimension_semantics<arbitrary>], iteration_bounds = array<i64: 1, 8>, scalar_prefetch = 0 : i64, scratch_operands = 0 : i64, tpu.core_type = #tpu.core_type<tc>, window_params = [{transform_indices = @transform_0, window_bounds = array<i64: 1>}, {transform_indices = @transform_1, window_bounds = array<i64: 1, 2, 1024>}, {transform_indices = @transform_2, window_bounds = array<i64: 2, 1024>}, {transform_indices = @transform_3, window_bounds = array<i64: 2, 2, 1024>}, {transform_indices = @transform_4, window_bounds = array<i64: 1, 2, 1024>}, {transform_indices = @transform_5, window_bounds = array<i64: 2, 1024>}, {transform_indices = @transform_6, window_bounds = array<i64: 2, 2, 1024>}]} {
    %c0_i32 = arith.constant 0 : i32
    %0 = arith.cmpi eq, %arg1, %c0_i32 : i32
    %1 = arith.extui %0 : i1 to i32
    %c0_i32_0 = arith.constant 0 : i32
    %2 = arith.cmpi ne, %1, %c0_i32_0 : i32
    scf.if %2 {
      %c0_19 = arith.constant 0 : index
      %c0_20 = arith.constant 0 : index
      %38 = vector.load %arg4[%c0_19, %c0_20] : memref<2x1024xf32, #tpu.memory_space<vmem>>, vector<2x1024xf32>
      %c0_21 = arith.constant 0 : index
      %c0_22 = arith.constant 0 : index
      %39 = vector.load %arg7[%c0_21, %c0_22] : memref<2x1024xf32, #tpu.memory_space<vmem>>, vector<2x1024xf32>
      tpu.vector_store %arg7[%c0_21, %c0_22], %38 {strides = array<i32>} : memref<2x1024xf32, #tpu.memory_space<vmem>>, vector<2x1024xf32>,
      %c0_23 = arith.constant 0 : index
      %c0_24 = arith.constant 0 : index
      %c0_25 = arith.constant 0 : index
      %40 = vector.load %arg5[%c0_23, %c0_24, %c0_25] : memref<2x2x1024xbf16, #tpu.memory_space<vmem>>, vector<2x2x1024xbf16>
      %c0_26 = arith.constant 0 : index
      %c0_27 = arith.constant 0 : index
      %c0_28 = arith.constant 0 : index
      %41 = vector.load %arg8[%c0_26, %c0_27, %c0_28] : memref<2x2x1024xbf16, #tpu.memory_space<vmem>>, vector<2x2x1024xbf16>
      tpu.vector_store %arg8[%c0_26, %c0_27, %c0_28], %40 {strides = array<i32>} : memref<2x2x1024xbf16, #tpu.memory_space<vmem>>, vector<2x2x1024xbf16>,
    } else {
    }
    %c0 = arith.constant 0 : index
    %3 = memref.load %arg2[%c0] : memref<1xf32, #tpu.memory_space<smem>>
    %c2_i32 = arith.constant 2 : i32
    %c0_i32_1 = arith.constant 0 : i32
    %4 = arith.cmpi eq, %c2_i32, %c0_i32_1 : i32
    %c1_i32 = arith.constant 1 : i32
    %5 = arith.select %4, %c1_i32, %c2_i32 : i32
    %6 = arith.remsi %arg1, %5 : i32
    %c0_i32_2 = arith.constant 0 : i32
    %7 = arith.cmpi ne, %6, %c0_i32_2 : i32
    %c0_i32_3 = arith.constant 0 : i32
    %8 = arith.cmpi slt, %6, %c0_i32_3 : i32
    %c0_i32_4 = arith.constant 0 : i32
    %9 = arith.cmpi slt, %5, %c0_i32_4 : i32
    %10 = arith.xori %8, %9 : i1
    %11 = arith.andi %10, %7 : i1
    %12 = arith.addi %6, %5 : i32
    %13 = arith.select %11, %12, %6 : i32
    %c0_5 = arith.constant 0 : index
    %c0_6 = arith.constant 0 : index
    %c0_7 = arith.constant 0 : index
    %14 = vector.load %arg3[%c0_5, %c0_6, %c0_7] : memref<1x2x1024xf32, #tpu.memory_space<vmem>>, vector<1x2x1024xf32>
    %15 = vector.shape_cast %14 : vector<1x2x1024xf32> to vector<2x1024xf32>
    %c0_8 = arith.constant 0 : index
    %c0_9 = arith.constant 0 : index
    %16 = vector.load %arg7[%c0_8, %c0_9] : memref<2x1024xf32, #tpu.memory_space<vmem>>, vector<2x1024xf32>
    %17 = arith.index_cast %13 : i32 to index
    %c0_10 = arith.constant 0 : index
    %c0_11 = arith.constant 0 : index
    %18 = vector.load %arg8[%17, %c0_10, %c0_11] : memref<2x2x1024xbf16, #tpu.memory_space<vmem>>, vector<1x2x1024xbf16>
    %19 = vector.shape_cast %18 : vector<1x2x1024xbf16> to vector<2x1024xbf16>
    %20 = arith.extf %19 : vector<2x1024xbf16> to vector<2x1024xf32>
    %cst = arith.constant 1.000000e+00 : f32
    %21 = vector.broadcast %cst : f32 to vector<2x1024xf32>
    %22 = arith.subf %21, %20 : vector<2x1024xf32>
    %23 = arith.mulf %16, %22 : vector<2x1024xf32>
    %24 = arith.addf %23, %15 : vector<2x1024xf32>
    %25 = vector.broadcast %3 : f32 to vector<2x1024xf32>
    %26 = arith.cmpf oge, %24, %25 : vector<2x1024xf32>
    %27 = arith.extui %26 : vector<2x1024xi1> to vector<2x1024xi32>
    %28 = arith.sitofp %27 : vector<2x1024xi32> to vector<2x1024xf32>
    %29 = arith.truncf %28 : vector<2x1024xf32> to vector<2x1024xbf16>
    %c0_12 = arith.constant 0 : index
    %c0_13 = arith.constant 0 : index
    %30 = vector.load %arg7[%c0_12, %c0_13] : memref<2x1024xf32, #tpu.memory_space<vmem>>, vector<2x1024xf32>
    tpu.vector_store %arg7[%c0_12, %c0_13], %24 {strides = array<i32>} : memref<2x1024xf32, #tpu.memory_space<vmem>>, vector<2x1024xf32>,
    %31 = arith.index_cast %13 : i32 to index
    %c0_14 = arith.constant 0 : index
    %c0_15 = arith.constant 0 : index
    %32 = vector.load %arg8[%31, %c0_14, %c0_15] : memref<2x2x1024xbf16, #tpu.memory_space<vmem>>, vector<1x2x1024xbf16>
    %33 = vector.shape_cast %32 : vector<1x2x1024xbf16> to vector<2x1024xbf16>
    %34 = vector.shape_cast %29 : vector<2x1024xbf16> to vector<1x2x1024xbf16>
    tpu.vector_store %arg8[%31, %c0_14, %c0_15], %34 {strides = array<i32>} : memref<2x2x1024xbf16, #tpu.memory_space<vmem>>, vector<1x2x1024xbf16>,
    %c0_16 = arith.constant 0 : index
    %c0_17 = arith.constant 0 : index
    %c0_18 = arith.constant 0 : index
    %35 = vector.load %arg6[%c0_16, %c0_17, %c0_18] : memref<1x2x1024xbf16, #tpu.memory_space<vmem>>, vector<1x2x1024xbf16>
    %36 = vector.shape_cast %35 : vector<1x2x1024xbf16> to vector<2x1024xbf16>
    %37 = vector.shape_cast %29 : vector<2x1024xbf16> to vector<1x2x1024xbf16>
    tpu.vector_store %arg6[%c0_16, %c0_17, %c0_18], %37 {strides = array<i32>} : memref<1x2x1024xbf16, #tpu.memory_space<vmem>>, vector<1x2x1024xbf16>,
    return
  }
  func.func @transform_0(%arg0: i32, %arg1: i32) -> i32 {
    %c0_i32 = arith.constant 0 : i32
    %c0_i32_0 = arith.constant 0 : i32
    return %c0_i32 : i32
  }
  func.func @transform_1(%arg0: i32, %arg1: i32) -> (i32, i32, i32) {
    %c0_i32 = arith.constant 0 : i32
    %c0_i32_0 = arith.constant 0 : i32
    return %arg1, %arg0, %c0_i32 : i32, i32, i32
  }
  func.func @transform_2(%arg0: i32, %arg1: i32) -> (i32, i32) {
    %c0_i32 = arith.constant 0 : i32
    %c0_i32_0 = arith.constant 0 : i32
    return %arg0, %c0_i32 : i32, i32
  }
  func.func @transform_3(%arg0: i32, %arg1: i32) -> (i32, i32, i32) {
    %c0_i32 = arith.constant 0 : i32
    %c0_i32_0 = arith.constant 0 : i32
    %c0_i32_1 = arith.constant 0 : i32
    return %c0_i32, %arg0, %c0_i32_0 : i32, i32, i32
  }
  func.func @transform_4(%arg0: i32, %arg1: i32) -> (i32, i32, i32) {
    %c0_i32 = arith.constant 0 : i32
    %c0_i32_0 = arith.constant 0 : i32
    return %arg1, %arg0, %c0_i32 : i32, i32, i32
  }
  func.func @transform_5(%arg0: i32, %arg1: i32) -> (i32, i32) {
    %c0_i32 = arith.constant 0 : i32
    %c0_i32_0 = arith.constant 0 : i32
    return %arg0, %c0_i32 : i32, i32
  }
  func.func @transform_6(%arg0: i32, %arg1: i32) -> (i32, i32, i32) {
    %c0_i32 = arith.constant 0 : i32
    %c0_i32_0 = arith.constant 0 : i32
    %c0_i32_1 = arith.constant 0 : i32
    return %c0_i32, %arg0, %c0_i32_0 : i32, i32, i32
  }
}

</mosaic_0001>

<bundles_post_ra>
// kernel: if_neuron_sequence.1
= control target key start
LH: loop header
LB: loop body
LE: loop exit
PB: predicated region body
PF: predicated region fallthrough
CT: control target
= control target key end

     0   :  { %s803_s23 = smov 0   ;;  %s805_s24 = smov 0   ;;  %s894_s0 = inlined_call_operand.<no memory space> [shape: f32[1], index: 0, kind: input, shape index: {}]   ;;  %s895_s1 = inlined_call_operand.vmem [shape: f32[8,2,1024], index: 1, kind: input, shape index: {}]   ;;  %s896_s2 = inlined_call_operand.vmem [shape: f32[2,1024], index: 2, kind: input, shape index: {}, may-alias: {2,5}]   ;;  %s897_s3 = inlined_call_operand.vmem [shape: bf16[2,2,1024], index: 3, kind: input, shape index: {}, may-alias: {3,6}]   ;;  %s898_s4 = inlined_call_operand.vmem [shape: bf16[8,2,1024], index: 4, kind: output, shape index: {0}]   ;;  %s899_s5 = inlined_call_operand.vmem [shape: f32[2,1024], index: 5, kind: output, shape index: {1}, may-alias: {2,5}]   ;;  %s900_s6 = inlined_call_operand.vmem [shape: bf16[2,2,1024], index: 6, kind: output, shape index: {2}, may-alias: {3,6}]  }
   0x1   :  { %12 = sst [smem:[#allocation2]] %s894_s0  ;;  %s807_s25 = smov 0  }
   0x2 LB: > { %s27_s0 = sadd.s32 1, %s756_s24  ;;  %p691_p0 = scmp.ge.s32.totalorder %s760_s25, 1  ;;  %s760_s25 = sphi %s807_s25, %s18_s25   ;;  %s756_s24 = sphi %s805_s24, %s902_s24   ;;  %s752_s23 = sphi %s803_s23, %s901_s23  }
   0x3   : > { %p28_p1 = scmp.ge.s32.totalorder %s27_s0, 8  ;;  %p257_p2 = scmp.lt.s32.totalorder %s760_s25, 9 }
   0x5   : > { %s904_s0 = smov (%p28_p1, %s27_s0), 0  ;;  %p258_p3 = pnand %p691_p0, %p257_p2 }
   0x6   : > { %p312_p4 = scmp.lt.s32.totalorder (!%p258_p3), %s752_s23, 7  ;;  %p695_p5 = scmp.ne.s32.totalorder (!%p258_p3), %s752_s23, 0 }
   0x7   : > { %261 = sbr.rel (%p258_p3) target bundleno = 67 (0x43), region = 36 }
   0xc   : > { %s313_s26 = scalar_select %p312_p4, %s752_s23, 7 }
   0xd   : > { %350 = sbr.rel (%p695_p5) target bundleno = 29 (0x1d), region = 40 }
   0xe   : > { %s710_s27 = sshll.u32 %s313_s26, 4  ;;  %s694_s28 = sshll.u32 %s313_s26, 3 }
   0xf   : > { %s828_s7 = scalar_lea.vmem %s895_s1, %s710_s27  ;;  %s833_s10 = scalar_lea.vmem %s898_s4, %s694_s28 }
  0x12   : > { %v351_v0 = vld [vmem:[%s896_s2] sm:$0xff]  ;;  %v352_v1 = vld [vmem:[%s896_s2 + $0x8] sm:$0xff] }
  0x13   : > { %v355_v2 = vld [vmem:[%s897_s3] sm:$0xff]  ;;  %353 = vst [vmem:[%s899_s5] sm:$0xff] %v351_v0  ;;  %354 = vst [vmem:[%s899_s5 + $0x8] sm:$0xff] %v352_v1 }
  0x14   : > { %357 = vst [vmem:[%s900_s6] sm:$0xff] %v355_v2 }
  0x1b   : > { %v356_v3 = vld [vmem:[%s897_s3 + $0x8] sm:$0xff] }
  0x1c   : > { %358 = vst [vmem:[%s900_s6 + $0x8] sm:$0xff] %v356_v3 }
  0x1d PF: > { %p360_p6 = scmp.lt.s32.totalorder %s752_s23, 0  ;;  %s361_s30 = ssub.s32 0, %s752_s23  ;;  %v762_v4 = vmov 1983009808   ;;  %v400_v6 = vlaneseq  ;;  %v374_v10 = vld [vmem:[%s899_s5] sm:$0xff]  ;;  %v375_v11 = vld [vmem:[%s899_s5 + $0x8] sm:$0xff] }
  0x1e   : > { %s696_s8 = smin.u32 %s752_s23, %s361_s30  ;;  %s359_s13 = sld [smem:[#allocation2]]  ;;  %v398_v5 = vunpack.c.l.s4 %v762_v4  ;;  %v372_v16 = vld [vmem:[%s828_s7] sm:$0xff]  ;;  %v763_v17 = vmov 1966171168   ;;  %v373_v19 = vld [vmem:[%s828_s7 + $0x8] sm:$0xff]  ;;  %v764_v27 = vmov 0.0  }
  0x1f   : > { %s363_s9 = sand.u32 1, %s696_s8   ;;  %v401_v14 = vshrl.u32 %v400_v6, 7  ;;  %v461_v18 = vunpack.c.l.s4 %v763_v17 }
  0x20   : > { %s364_s11 = ssub.s32 0, %s363_s9  ;;  %v399_v13 = vunpack.c.0.s8 %v398_v5 }
  0x21   : > { %s906_s11 = smov (!%p360_p6, %s364_s11), %s363_s9  ;;  %v462_v26 = vunpack.c.0.s8 %v461_v18 }
  0x22   : > { %p698_p7 = scmp.lt.s32.totalorder %s906_s11, 0  ;;  %s370_s12 = sadd.s32 2, %s906_s11  ;;  %v402_v24 = vsub.s32 %v399_v13, %v401_v14 }
  0x23   : > { %v465_v34 = vsub.s32 %v462_v26, %v401_v14 }
  0x24   : > { %s908_s12 = smov (!%p698_p7, %s370_s12), %s906_s11  ;;  %v387_v22 = vstv %s359_s13 }
  0x25   : > { %s699_s14 = sshll.u32 %s908_s12, 3 }
  0x26   : > { %s866_s17 = scalar_lea.vmem %s900_s6, %s699_s14 }
  0x27   : > { %v378_v7 = vld [vmem:[%s866_s17] sm:$0xff] }
  0x28   : > { %v379_v8 = vunpack.c.l.bf16 %v378_v7  ;;  %v380_v9 = vunpack.c.h.bf16 %v378_v7 }
  0x2a   : > { %v381_v12 = vsub.f32 1.0, %v379_v8  ;;  %v382_v15 = vsub.f32 1.0, %v380_v9 }
  0x2c   : > { %v383_v20 = vmul.f32 %v381_v12, %v374_v10  ;;  %v384_v21 = vmul.f32 %v382_v15, %v375_v11 }
  0x2e   : > { %v385_v23 = vadd.f32 %v383_v20, %v372_v16  ;;  %v386_v25 = vadd.f32 %v384_v21, %v373_v19 }
  0x30   : > { %vm388_vm0 = vcmp.ge.f32.partialorder %v385_v23, %v387_v22  ;;  %446 = vst [vmem:[%s899_s5] sm:$0xff] %v385_v23  ;;  %vm389_vm1 = vcmp.ge.f32.partialorder %v386_v25, %v387_v22  ;;  %447 = vst [vmem:[%s899_s5 + $0x8] sm:$0xff] %v386_v25 }
  0x31   : > { %v700_v28 = vsel %vm388_vm0, 1.0, %v764_v27  ;;  %v701_v29 = vsel %vm389_vm1, 1.0, %v764_v27 }
  0x32   : > { %v396_v30 = vcombine.high %v700_v28, %v700_v28  ;;  %v403_v31 = vrot.slane %v700_v28, %v402_v24  ;;  %v413_v32 = vcombine.high %v701_v29, %v701_v29  ;;  %v420_v33 = vrot.slane %v701_v29, %v402_v24 }
  0x34   : > { %v410_v35 = vrot.slane %v396_v30, %v402_v24  ;;  %v411_v36 = vcombine.high %v403_v31, %v403_v31  ;;  %v427_v37 = vrot.slane %v413_v32, %v402_v24  ;;  %v428_v38 = vcombine.high %v420_v33, %v420_v33 }
  0x36   : > { %v412_v39 = vcombine.high %v410_v35, %v410_v35  ;;  %v702_v40 = vpack.c.bf16 %v411_v36, %v403_v31  ;;  %v429_v41 = vcombine.high %v427_v37, %v427_v37  ;;  %v704_v42 = vpack.c.bf16 %v428_v38, %v420_v33 }
  0x38   : > { %v703_v43 = vpack.c.bf16 %v412_v39, %v410_v35  ;;  %v466_v44 = vrot.slane %v702_v40, %v465_v34  ;;  %v705_v45 = vpack.c.bf16 %v429_v41, %v427_v37  ;;  %v480_v46 = vrot.slane %v704_v42, %v465_v34 }
  0x3a   : > { %v473_v47 = vrot.slane %v703_v43, %v465_v34  ;;  %v487_v48 = vrot.slane %v705_v45, %v465_v34 }
  0x3c   : > { %v488_v49 = vcombine.low %v466_v44, %v473_v47  ;;  %v489_v50 = vcombine.low %v480_v46, %v487_v48 }
  0x3e   : > { %v496_v51 = vrot.slane %v488_v49, %v465_v34  ;;  %v503_v52 = vrot.slane %v489_v50, %v465_v34 }
  0x40   : > { %v504_v53 = vcombine.low %v496_v51, %v503_v52 }
  0x42   : > { %506 = vst [vmem:[%s866_s17] sm:$0xff] %v504_v53  ;;  %507 = vst [vmem:[%s833_s10] sm:$0xff] %v504_v53 }
  0x43 PF: > { %s18_s25 = sadd.s32 1, %s760_s25   ;;  %s901_s23 = smov %s756_s24 }
  0x44   : > { %p15_p8 = scmp.ge.s32.totalorder %s18_s25, 10   ;;  %s902_s24 = smov %s904_s0 }
  0x46   :  { %17 = sbr.rel (!%p15_p8) target bundleno = 2 (0x2), region = 101 }

</bundles_post_ra>
